<compile_context>
chip_gen: v6e
topology: v6e:2x2x1
jax: 0.10.0
libtpu: 0.0.40
codegen_flags: <defaults>
</compile_context>

<pallas_src>
import functools

import jax
import jax.numpy as jnp
from jax.experimental import pallas as pl
from jax.experimental.pallas import tpu as pltpu

NEG_SLOPE = 0.01        # nn.LeakyReLU default negative_slope
LANE = 128              # TPU lane width
TILE_B_ALIGN = 16       # bf16 packs 16 rows per sublane group
DEFAULT_TILE_B = 2048   # amortize ~0.35us/step grid overhead; footprint stays small


def _round_up(x, m):
    return (x + m - 1) // m * m


def _leaky_relu(x):
    return jnp.where(x >= 0, x, NEG_SLOPE * x)


def reward_net_kernel(x_ref, w1_ref, b1_ref, w2_ref, b2_ref, w3_ref, b3_ref,
                      o_ref, *, active):
    # Raw f32 x -> bf16 MXU operand (VPU cast is free in a mem-bound kernel).
    x = x_ref[...].astype(w1_ref.dtype)
    # Layer 1: Linear + LeakyReLU (bf16 MXU operands, f32 accumulation/elementwise)
    h = jnp.dot(x, w1_ref[...], preferred_element_type=jnp.float32)
    h = _leaky_relu(h + b1_ref[...])
    # Layer 2: Linear + LeakyReLU
    h = jnp.dot(h.astype(w2_ref.dtype), w2_ref[...],
                preferred_element_type=jnp.float32)
    h = _leaky_relu(h + b2_ref[...])
    # Layer 3: Linear + output activation (static branch, resolved at trace time)
    y = jnp.dot(h.astype(w3_ref.dtype), w3_ref[...],
                preferred_element_type=jnp.float32)
    y = y + b3_ref[...]
    if active == 'sig':
        y = jax.nn.sigmoid(y)
    elif active == 'tan':
        y = jnp.tanh(y)
    elif active == 'no':
        pass
    else:
        y = jnp.maximum(y, 0.0)
    o_ref[...] = y.astype(o_ref.dtype)


def reward_net_forward(x, params, active, *, tile_b=None,
                       param_dtype=jnp.bfloat16):
    """x: [B, in_size] float32. params: dict of w1,b1,w2,b2,w3,b3 (f32, weights
    stored [in_features, out_features]). Returns [B, out_size] float32."""
    B, in_size = x.shape
    hid = params["w1"].shape[1]
    out_size = params["w3"].shape[1]

    # Pad ONLY the hidden dim (VMEM-resident, loaded once); x / output feature
    # dims stay at their real widths so the two HBM streams carry no waste.
    hid_p = _round_up(hid, LANE)
    w1 = jnp.pad(params["w1"], ((0, 0), (0, hid_p - hid))).astype(param_dtype)
    b1 = jnp.pad(params["b1"], ((0, 0), (0, hid_p - hid)))
    w2 = jnp.pad(params["w2"], ((0, hid_p - hid), (0, hid_p - hid))).astype(param_dtype)
    b2 = jnp.pad(params["b2"], ((0, 0), (0, hid_p - hid)))
    w3 = jnp.pad(params["w3"], ((0, hid_p - hid), (0, 0))).astype(param_dtype)
    b3 = params["b3"]

    # Batch tile: multiple of 16; ragged last tile handled by clamped DMAs so x
    # needs no batch padding (and no materialized padded copy in HBM).
    if tile_b is None:
        tile_b = DEFAULT_TILE_B
    tile_b = max(TILE_B_ALIGN, _round_up(min(tile_b, B), TILE_B_ALIGN))
    # v7x has 2 TensorCores: guarantee >= 2 batch tiles when the batch allows.
    if pl.cdiv(B, tile_b) < 2 and B > TILE_B_ALIGN:
        tile_b = _round_up(pl.cdiv(B, 2), TILE_B_ALIGN)
    n_tiles = pl.cdiv(B, tile_b)

    itemsz = lambda a: a.size * a.dtype.itemsize
    weight_bytes = sum(itemsz(a) for a in (w1, b1, w2, b2, w3, b3))

    # Cost estimate with the real (unpadded) problem shapes.
    cost = pl.CostEstimate(
        flops=2 * B * (in_size * hid + hid * hid + hid * out_size),
        transcendentals=B * out_size if active in ("sig", "tan") else 0,
        bytes_accessed=B * in_size * x.dtype.itemsize + weight_bytes
                       + B * out_size * 4,
    )

    # Constant-index weight/bias blocks never re-DMA; drop them to a single VMEM
    # buffer once they're big enough that the default 2x buffering matters.
    single_buffer = weight_bytes > (4 << 20) and hasattr(pl, "Buffered")

    def resident(a):
        if single_buffer:
            return pl.BlockSpec(a.shape, lambda i: (0, 0),
                                pipeline_mode=pl.Buffered(1))
        return pl.BlockSpec(a.shape, lambda i: (0, 0))

    # VMEM budget: double-buffered x / out tiles + resident weights + intermediates.
    wbuf = 1 if single_buffer else 2
    vmem_est = (2 * tile_b * in_size * x.dtype.itemsize
                + 2 * tile_b * out_size * 4
                + wbuf * weight_bytes
                + 3 * tile_b * hid_p * 4)
    try:  # per-generation physical VMEM (64 MiB on v7x, 128 MiB on v5e/v6e)
        vmem_cap = pltpu.get_tpu_info().vmem_capacity_bytes
    except Exception:
        vmem_cap = 64 << 20  # conservative (v7x) fallback
    # Always pass an explicit limit (v5e's default scoped VMEM is only 16 MiB).
    vmem_limit = int(min(max(2 * vmem_est, 32 << 20), 0.75 * vmem_cap))
    # TODO(synk): if resident weights stop fitting (~>48 MiB on v7x, hidden >= ~4K),
    # add a K-tiled reduction grid axis ("arbitrary") with an f32 accumulator
    # scratch instead of keeping all weights VMEM-resident.

    compiler_params = pltpu.CompilerParams(
        dimension_semantics=("parallel",),   # shard batch tiles across TensorCores
        vmem_limit_bytes=vmem_limit,
    )

    kernel = functools.partial(reward_net_kernel, active=active)

    return pl.pallas_call(
        kernel,
        out_shape=jax.ShapeDtypeStruct((B, out_size), jnp.float32),
        grid=(n_tiles,),
        in_specs=[
            pl.BlockSpec((tile_b, in_size), lambda i: (i, 0)),   # x: batch-tiled
            resident(w1), resident(b1),
            resident(w2), resident(b2),
            resident(w3), resident(b3),
        ],
        out_specs=pl.BlockSpec((tile_b, out_size), lambda i: (i, 0)),
        compiler_params=compiler_params,
        cost_estimate=cost,
    )(x, w1, b1, w2, b2, w3, b3)


def init_params(key, in_size, hidden_size, out_size):
    """Deterministic init mimicking nn.Linear's U(-1/sqrt(fan_in), 1/sqrt(fan_in)).
    Weights stored [in_features, out_features] so the kernel computes x @ W + b."""
    ks = jax.random.split(key, 6)

    def linear(kw, kb, fan_in, fan_out):
        bound = 1.0 / jnp.sqrt(fan_in)
        w = jax.random.uniform(kw, (fan_in, fan_out), jnp.float32, -bound, bound)
        b = jax.random.uniform(kb, (1, fan_out), jnp.float32, -bound, bound)
        return w, b

    w1, b1 = linear(ks[0], ks[1], in_size, hidden_size)
    w2, b2 = linear(ks[2], ks[3], hidden_size, hidden_size)
    w3, b3 = linear(ks[4], ks[5], hidden_size, out_size)
    return {"w1": w1, "b1": b1, "w2": w2, "b2": b2, "w3": w3, "b3": b3}


def reference_forward(x, p, active, matmul_dtype=jnp.bfloat16):
    """Pure-JAX reference matching the kernel's bf16-matmul / f32-elementwise math."""
    c = lambda a: a.astype(matmul_dtype)
    h = jnp.dot(c(x), c(p["w1"]), preferred_element_type=jnp.float32) + p["b1"]
    h = jnp.where(h >= 0, h, NEG_SLOPE * h)
    h = jnp.dot(c(h), c(p["w2"]), preferred_element_type=jnp.float32) + p["b2"]
    h = jnp.where(h >= 0, h, NEG_SLOPE * h)
    y = jnp.dot(c(h), c(p["w3"]), preferred_element_type=jnp.float32) + p["b3"]
    if active == 'sig':
        return jax.nn.sigmoid(y)
    if active == 'tan':
        return jnp.tanh(y)
    if active == 'no':
        return y
    return jnp.maximum(y, 0.0)


if __name__ == "__main__":
    key = jax.random.PRNGKey(0)
    k_x, k_p = jax.random.split(key)

    # Small shapes consistent with the module; batch=200 exercises the default
    # >=2-tile split plus a ragged (clamped) last tile.
    batch, in_size, hidden_size, out_size = 200, 16, 32, 4
    active = "tan"

    x = jax.random.normal(k_x, (batch, in_size), dtype=jnp.float32)
    params = init_params(k_p, in_size, hidden_size, out_size)

    ref = reference_forward(x, params, active)
    ref_f32 = reference_forward(x, params, active, matmul_dtype=jnp.float32)

    # Default tiling (2 tiles of 112 rows, last one ragged).
    out = jax.block_until_ready(reward_net_forward(x, params, active))
    assert out.shape == (batch, out_size), out.shape
    assert jnp.allclose(out, ref, atol=2e-3, rtol=2e-3), \
        float(jnp.max(jnp.abs(out - ref)))
    # Loose sanity check against a full-f32 reference (bf16 matmul rounding).
    assert jnp.allclose(out, ref_f32, atol=5e-2, rtol=5e-2)

    # Explicit smaller tile (4 steps, ragged last) to exercise multi-step pipelining.
    out2 = jax.block_until_ready(reward_net_forward(x, params, active, tile_b=64))
    assert out2.shape == (batch, out_size), out2.shape
    assert jnp.allclose(out2, ref, atol=2e-3, rtol=2e-3), \
        float(jnp.max(jnp.abs(out2 - ref)))

    print("KERNEL_OK")
</pallas_src>

<mosaic_0001>
module attributes {stable_mosaic.version = 11 : i64} {
  func.func @reward_net_kernel(%arg0: i32, %arg1: memref<112x16xf32, #tpu.memory_space<vmem>>, %arg2: memref<16x128xbf16, #tpu.memory_space<vmem>>, %arg3: memref<1x128xf32, #tpu.memory_space<vmem>>, %arg4: memref<128x128xbf16, #tpu.memory_space<vmem>>, %arg5: memref<1x128xf32, #tpu.memory_space<vmem>>, %arg6: memref<128x4xbf16, #tpu.memory_space<vmem>>, %arg7: memref<1x4xf32, #tpu.memory_space<vmem>>, %arg8: memref<112x4xf32, #tpu.memory_space<vmem>>) attributes {dimension_semantics = [#tpu.dimension_semantics<parallel>], iteration_bounds = array<i64: 2>, scalar_prefetch = 0 : i64, scratch_operands = 0 : i64, tpu.core_type = #tpu.core_type<tc>, window_params = [{transform_indices = @transform_0, window_bounds = array<i64: 112, 16>}, {pipeline_mode = #tpu.pipeline_mode<synchronous>, transform_indices = @transform_1, window_bounds = array<i64: 16, 128>}, {pipeline_mode = #tpu.pipeline_mode<synchronous>, transform_indices = @transform_2, window_bounds = array<i64: 1, 128>}, {pipeline_mode = #tpu.pipeline_mode<synchronous>, transform_indices = @transform_3, window_bounds = array<i64: 128, 128>}, {pipeline_mode = #tpu.pipeline_mode<synchronous>, transform_indices = @transform_4, window_bounds = array<i64: 1, 128>}, {pipeline_mode = #tpu.pipeline_mode<synchronous>, transform_indices = @transform_5, window_bounds = array<i64: 128, 4>}, {pipeline_mode = #tpu.pipeline_mode<synchronous>, transform_indices = @transform_6, window_bounds = array<i64: 1, 4>}, {transform_indices = @transform_7, window_bounds = array<i64: 112, 4>}]} {
    %c0 = arith.constant 0 : index
    %c0_0 = arith.constant 0 : index
    %0 = vector.load %arg1[%c0, %c0_0] : memref<112x16xf32, #tpu.memory_space<vmem>>, vector<112x16xf32>
    %1 = arith.truncf %0 : vector<112x16xf32> to vector<112x16xbf16>
    %c0_1 = arith.constant 0 : index
    %c0_2 = arith.constant 0 : index
    %2 = vector.load %arg2[%c0_1, %c0_2] : memref<16x128xbf16, #tpu.memory_space<vmem>>, vector<16x128xbf16>
    %cst = arith.constant dense<0.000000e+00> : vector<112x128xf32>
    %3 = tpu.matmul %1, %2, %cst {dimension_numbers = #tpu.dot_dimension_numbers<[1], [0], [0], [1], [0, 0, 1, 1], [], []>} : vector<112x16xbf16>, vector<16x128xbf16>, vector<112x128xf32> -> vector<112x128xf32>
    %c0_3 = arith.constant 0 : index
    %c0_4 = arith.constant 0 : index
    %4 = vector.load %arg3[%c0_3, %c0_4] : memref<1x128xf32, #tpu.memory_space<vmem>>, vector<1x128xf32>
    %5 = vector.broadcast %4 : vector<1x128xf32> to vector<112x128xf32>
    %6 = arith.addf %3, %5 : vector<112x128xf32>
    %cst_5 = arith.constant 0.000000e+00 : f32
    %7 = vector.broadcast %cst_5 : f32 to vector<112x128xf32>
    %8 = arith.cmpf oge, %6, %7 : vector<112x128xf32>
    %cst_6 = arith.constant 0.00999999977 : f32
    %9 = vector.broadcast %cst_6 : f32 to vector<112x128xf32>
    %10 = arith.mulf %9, %6 : vector<112x128xf32>
    %11 = arith.select %8, %6, %10 : vector<112x128xi1>, vector<112x128xf32>
    %12 = arith.truncf %11 : vector<112x128xf32> to vector<112x128xbf16>
    %c0_7 = arith.constant 0 : index
    %c0_8 = arith.constant 0 : index
    %13 = vector.load %arg4[%c0_7, %c0_8] : memref<128x128xbf16, #tpu.memory_space<vmem>>, vector<128x128xbf16>
    %cst_9 = arith.constant dense<0.000000e+00> : vector<112x128xf32>
    %14 = tpu.matmul %12, %13, %cst_9 {dimension_numbers = #tpu.dot_dimension_numbers<[1], [0], [0], [1], [0, 0, 1, 1], [], []>} : vector<112x128xbf16>, vector<128x128xbf16>, vector<112x128xf32> -> vector<112x128xf32>
    %c0_10 = arith.constant 0 : index
    %c0_11 = arith.constant 0 : index
    %15 = vector.load %arg5[%c0_10, %c0_11] : memref<1x128xf32, #tpu.memory_space<vmem>>, vector<1x128xf32>
    %16 = vector.broadcast %15 : vector<1x128xf32> to vector<112x128xf32>
    %17 = arith.addf %14, %16 : vector<112x128xf32>
    %cst_12 = arith.constant 0.000000e+00 : f32
    %18 = vector.broadcast %cst_12 : f32 to vector<112x128xf32>
    %19 = arith.cmpf oge, %17, %18 : vector<112x128xf32>
    %cst_13 = arith.constant 0.00999999977 : f32
    %20 = vector.broadcast %cst_13 : f32 to vector<112x128xf32>
    %21 = arith.mulf %20, %17 : vector<112x128xf32>
    %22 = arith.select %19, %17, %21 : vector<112x128xi1>, vector<112x128xf32>
    %23 = arith.truncf %22 : vector<112x128xf32> to vector<112x128xbf16>
    %c0_14 = arith.constant 0 : index
    %c0_15 = arith.constant 0 : index
    %24 = vector.load %arg6[%c0_14, %c0_15] : memref<128x4xbf16, #tpu.memory_space<vmem>>, vector<128x4xbf16>
    %cst_16 = arith.constant dense<0.000000e+00> : vector<112x4xf32>
    %25 = tpu.matmul %23, %24, %cst_16 {dimension_numbers = #tpu.dot_dimension_numbers<[1], [0], [0], [1], [0, 0, 1, 1], [], []>} : vector<112x128xbf16>, vector<128x4xbf16>, vector<112x4xf32> -> vector<112x4xf32>
    %c0_17 = arith.constant 0 : index
    %c0_18 = arith.constant 0 : index
    %26 = vector.load %arg7[%c0_17, %c0_18] : memref<1x4xf32, #tpu.memory_space<vmem>>, vector<1x4xf32>
    %27 = vector.broadcast %26 : vector<1x4xf32> to vector<112x4xf32>
    %28 = arith.addf %25, %27 : vector<112x4xf32>
    %29 = math.tanh %28 : vector<112x4xf32>
    %c0_19 = arith.constant 0 : index
    %c0_20 = arith.constant 0 : index
    %30 = vector.load %arg8[%c0_19, %c0_20] : memref<112x4xf32, #tpu.memory_space<vmem>>, vector<112x4xf32>
    tpu.vector_store %arg8[%c0_19, %c0_20], %29 {strides = array<i32>} : memref<112x4xf32, #tpu.memory_space<vmem>>, vector<112x4xf32>,
    return
  }
  func.func @transform_0(%arg0: i32) -> (i32, i32) {
    %c0_i32 = arith.constant 0 : i32
    %c0_i32_0 = arith.constant 0 : i32
    return %arg0, %c0_i32 : i32, i32
  }
  func.func @transform_1(%arg0: i32) -> (i32, i32) {
    %c0_i32 = arith.constant 0 : i32
    %c0_i32_0 = arith.constant 0 : i32
    %c0_i32_1 = arith.constant 0 : i32
    return %c0_i32, %c0_i32_0 : i32, i32
  }
  func.func @transform_2(%arg0: i32) -> (i32, i32) {
    %c0_i32 = arith.constant 0 : i32
    %c0_i32_0 = arith.constant 0 : i32
    %c0_i32_1 = arith.constant 0 : i32
    return %c0_i32, %c0_i32_0 : i32, i32
  }
  func.func @transform_3(%arg0: i32) -> (i32, i32) {
    %c0_i32 = arith.constant 0 : i32
    %c0_i32_0 = arith.constant 0 : i32
    %c0_i32_1 = arith.constant 0 : i32
    return %c0_i32, %c0_i32_0 : i32, i32
  }
  func.func @transform_4(%arg0: i32) -> (i32, i32) {
    %c0_i32 = arith.constant 0 : i32
    %c0_i32_0 = arith.constant 0 : i32
    %c0_i32_1 = arith.constant 0 : i32
    return %c0_i32, %c0_i32_0 : i32, i32
  }
  func.func @transform_5(%arg0: i32) -> (i32, i32) {
    %c0_i32 = arith.constant 0 : i32
    %c0_i32_0 = arith.constant 0 : i32
    %c0_i32_1 = arith.constant 0 : i32
    return %c0_i32, %c0_i32_0 : i32, i32
  }
  func.func @transform_6(%arg0: i32) -> (i32, i32) {
    %c0_i32 = arith.constant 0 : i32
    %c0_i32_0 = arith.constant 0 : i32
    %c0_i32_1 = arith.constant 0 : i32
    return %c0_i32, %c0_i32_0 : i32, i32
  }
  func.func @transform_7(%arg0: i32) -> (i32, i32) {
    %c0_i32 = arith.constant 0 : i32
    %c0_i32_0 = arith.constant 0 : i32
    return %arg0, %c0_i32 : i32, i32
  }
}

</mosaic_0001>

<bundles_post_ra>
// kernel: tpu_custom_call.1
= control target key start
LH: loop header
LB: loop body
LE: loop exit
PB: predicated region body
PF: predicated region fallthrough
CT: control target
= control target key end

     0   :  { %s1639_s24 = smov 0   ;;  %s1641_s25 = smov 0   ;;  %s1989_s0 = inlined_call_operand.vmem [shape: f32[200,16], index: 0, kind: input, shape index: {}]   ;;  %s1990_s1 = inlined_call_operand.vmem [shape: bf16[16,128], index: 1, kind: input, shape index: {}]   ;;  %s1991_s2 = inlined_call_operand.vmem [shape: f32[1,128], index: 2, kind: input, shape index: {}]   ;;  %s1992_s3 = inlined_call_operand.vmem [shape: bf16[128,128], index: 3, kind: input, shape index: {}]   ;;  %s1993_s4 = inlined_call_operand.vmem [shape: f32[1,128], index: 4, kind: input, shape index: {}]   ;;  %s1994_s5 = inlined_call_operand.vmem [shape: bf16[128,4], index: 5, kind: input, shape index: {}]   ;;  %s1995_s6 = inlined_call_operand.vmem [shape: f32[1,4], index: 6, kind: input, shape index: {}]   ;;  %s1996_s7 = inlined_call_operand.vmem [shape: f32[200,4], index: 7, kind: output, shape index: {}]  }
   0x1   :  { %s1643_s26 = smov 0  }
   0x2 LB: > { %s1652_s27 = sadd.s32 4294967295, %s1563_s26   ;;  %s1654_s28 = sadd.s32 1, %s1563_s26   ;;  %s1563_s26 = sphi %s1643_s26, %s2003_s26   ;;  %s1559_s25 = sphi %s1641_s25, %s2002_s25   ;;  %s1555_s24 = sphi %s1639_s24, %s2001_s24  }
   0x3   : > { %s173_s29 = ssub.s32 %s1563_s26, %s1654_s28  ;;  %s176_s30 = sadd.s32 1, %s1559_s25 }
   0x4   : > { %p174_p0 = scmp.eq.s32.totalorder %s173_s29, 0  ;;  %p186_p1 = scmp.ne.s32.totalorder %s1559_s25, %s1555_s24 }
   0x5   : > { %p187_p2 = scmp.eq.s32.totalorder %s1652_s27, 1  ;;  %p1168_p3 = scmp.ge.s32.totalorder %s1563_s26, 1 }
   0x6   : > { %s1662_s8 = scalar_select %p174_p0, %s1559_s25, %s176_s30  }
   0x7   : > { %p1664_p4 = por %p187_p2, %p186_p1  ;;  %p246_p5 = scmp.lt.s32.totalorder %s1563_s26, 3 }
   0x9   : > { %p247_p6 = pnand %p1168_p3, %p246_p5 }
   0xa   : > { %s1673_s12 = smul.u32 (!%p247_p6), 14, %s1652_s27  ;;  %s278_s26 = sand.u32 (!%p247_p6), 1, %s1555_s24  }
   0xb   : > { %250 = sbr.rel (%p247_p6) target bundleno = 746 (0x2ea), region = 48 }
   0xc   : > { %p286_p7 = scmp.lt.s32.totalorder (!%p247_p6), %s1673_s12, 24  ;;  %s1368_s29 = smul.u32 (!%p247_p6), 112, %s278_s26 }
   0xe   : > { %s1858_s30 = scalar_lea.vmem (!%p247_p6), [#allocation2], %s1368_s29  }
  0x10   : > { %v1460_v0 = vld [vmem:[%s1990_s1] sm:$0xff]   ;;  %v1597_v1 = vmov 0.0   ;;  %vm1598_vm0 = vmmov 0   ;;  %s287_s13 = scalar_select %p286_p7, %s1673_s12, 24  ;;  %vm337_vm1 = vcmask 130048   ;;  %v1461_v7 = vld [vmem:[%s1992_s3 + $0x38] sm:$0xff]  }
  0x11   : > { %1248 = vmatprep.subr.bf16.mxu0 %v1597_v1  ;;  %1366 = vmatprep.subr.bf16.mxu1 %v1597_v1  ;;  %v1462_v13 = vld [vmem:[%s1992_s3 + $0x30] sm:$0xff]   ;;  %v1463_v16 = vld [vmem:[%s1992_s3 + $0x28] sm:$0xff]   ;;  %v1464_v22 = vld [vmem:[%s1992_s3 + $0x20] sm:$0xff]   ;;  %s903_s24 = ssub.s32 (%p1664_p4), 25, %s1673_s12  ;;  %s1209_s10 = smul.u32 (%p1664_p4), 112, %s1652_s27 }
  0x12   : > { %1249 = vmatpush3.bf16.msra.mxu0 %v1460_v0  ;;  %1250 = vmatprep.mubr.msk.bf16.mxu0 %vm1598_vm0, %v1597_v1  ;;  %s1169_s14 = sshll.u32 %s287_s13, 3  ;;  %v1465_v24 = vld [vmem:[%s1992_s3 + $0x18] sm:$0xff]   ;;  %v1466_v28 = vld [vmem:[%s1992_s3 + $0x10] sm:$0xff]   ;;  %v1467_v29 = vld [vmem:[%s1992_s3 + $0x8] sm:$0xff]   ;;  %p904_p8 = scmp.lt.s32.totalorder (%p1664_p4), %s903_s24, 14 }
  0x13   : > { %1367 = vmatpush3.bf16.msra.mxu1 %v1460_v0  ;;  %1266 = vmatprep.mubr.msk.bf16.mxu1 %vm1598_vm0, %v1597_v1  ;;  %s1687_s17 = scalar_lea.vmem %s1989_s0, %s1169_s14  ;;  %v1468_v30 = vld [vmem:[%s1992_s3] sm:$0xff]   ;;  %v1469_v31 = vld [vmem:[%s1994_s5 + $0x38] sm:$0xff]   ;;  %v1470_v32 = vld [vmem:[%s1994_s5 + $0x30] sm:$0xff]   ;;  %s1905_s14 = scalar_lea.vmem (%p1664_p4), %s1996_s7, %s1209_s10  }
  0x14   : > { %1278 = vmatprep.subr.bf16.mxu1 %v1597_v1  ;;  %1322 = vmatprep.subr.bf16.mxu0 %v1597_v1  ;;  %v301_v2 = vld [vmem:[%s1687_s17] sm:$0xff]  ;;  %v302_v3 = vld [vmem:[%s1687_s17 + $0x8] sm:$0xff]  ;;  %v303_v8 = vld [vmem:[%s1687_s17 + $0x10] sm:$0xff] }
  0x15   : > { %v315_v4 = vpack.c.bf16 %v302_v3, %v301_v2  ;;  %v309_v5 = vld [vmem:[%s1687_s17 + $0x40] sm:$0xff]  ;;  %v310_v6 = vld [vmem:[%s1687_s17 + $0x48] sm:$0xff]  ;;  %v304_v9 = vld [vmem:[%s1687_s17 + $0x18] sm:$0xff] }
  0x16   : > { %v319_v10 = vpack.c.bf16 %v310_v6, %v309_v5  ;;  %v311_v11 = vld [vmem:[%s1687_s17 + $0x50] sm:$0xff]  ;;  %v312_v12 = vld [vmem:[%s1687_s17 + $0x58] sm:$0xff]  ;;  %v316_v14 = vpack.c.bf16 %v304_v9, %v303_v8  ;;  %v305_v17 = vld [vmem:[%s1687_s17 + $0x20] sm:$0xff] }
  0x17   : > { %1251 = vmatmul.mubr.msk.bf16.vlgmr.msra.gmra.mxu0 %vm337_vm1, %v315_v4  ;;  %v320_v15 = vpack.c.bf16 %v312_v12, %v311_v11  ;;  %v306_v18 = vld [vmem:[%s1687_s17 + $0x28] sm:$0xff]  ;;  %v313_v20 = vld [vmem:[%s1687_s17 + $0x60] sm:$0xff]  ;;  %v307_v25 = vld [vmem:[%s1687_s17 + $0x30] sm:$0xff] }
  0x18   : > { %1254 = vmatprep.mubr.msk.bf16.mxu0 %vm1598_vm0, %v1597_v1  ;;  %1267 = vmatmul.mubr.msk.bf16.vlgmr.msra.gmra.mxu1 %vm337_vm1, %v319_v10  ;;  %v317_v19 = vpack.c.bf16 %v306_v18, %v305_v17  ;;  %v314_v21 = vld [vmem:[%s1687_s17 + $0x68] sm:$0xff]  ;;  %v308_v26 = vld [vmem:[%s1687_s17 + $0x38] sm:$0xff]  ;;  %v1472_v34 = vld [vmem:[%s1994_s5 + $0x20] sm:$0xff]  }
  0x19   : > { %1270 = vmatprep.mubr.msk.bf16.mxu1 %vm1598_vm0, %v1597_v1  ;;  %1279 = vmatpush3.bf16.msra.mxu1 %v1461_v7  ;;  %v321_v23 = vpack.c.bf16 %v314_v21, %v313_v20  ;;  %v318_v27 = vpack.c.bf16 %v308_v26, %v307_v25  ;;  %v1471_v33 = vld [vmem:[%s1994_s5 + $0x28] sm:$0xff]   ;;  %v1473_v35 = vld [vmem:[%s1994_s5 + $0x18] sm:$0xff]   ;;  %v1778_v36 = vld [vmem:[%s1991_s2] ss:$0 sm:$0xff] }
  0x1a   : > { %1280 = vmatprep.subr.bf16.mxu1 %v1597_v1  ;;  %1323 = vmatpush3.bf16.msra.mxu0 %v1469_v31 }
  0x1b   : > { %1324 = vmatprep.subr.bf16.mxu0 %v1597_v1 }
  0x1d   : > { %1281 = vmatpush3.bf16.msra.mxu1 %v1462_v13 }
  0x1e   : > { %1282 = vmatprep.subr.bf16.mxu1 %v1597_v1  ;;  %1325 = vmatpush3.bf16.msra.mxu0 %v1470_v32 }
  0x1f   : > { %1255 = vmatmul.mubr.msk.bf16.gmra.mxu0 %vm337_vm1, %v316_v14  ;;  %1326 = vmatprep.subr.bf16.mxu0 %v1597_v1 }
  0x20   : > { %1258 = vmatprep.mubr.msk.bf16.mxu0 %vm1598_vm0, %v1597_v1  ;;  %1271 = vmatmul.mubr.msk.bf16.gmra.mxu1 %vm337_vm1, %v320_v15 }
  0x21   : > { %1274 = vmatprep.mubr.msk.bf16.mxu1 %vm1598_vm0, %v1597_v1  ;;  %1283 = vmatpush3.bf16.msra.mxu1 %v1463_v16 }
  0x22   : > { %1284 = vmatprep.subr.bf16.mxu1 %v1597_v1  ;;  %1327 = vmatpush3.bf16.msra.mxu0 %v1471_v33 }
  0x23   : > { %1328 = vmatprep.subr.bf16.mxu0 %v1597_v1 }
  0x25   : > { %1285 = vmatpush3.bf16.msra.mxu1 %v1464_v22 }
  0x26   : > { %1286 = vmatprep.subr.bf16.mxu1 %v1597_v1  ;;  %1329 = vmatpush3.bf16.msra.mxu0 %v1472_v34 }
  0x27   : > { %1259 = vmatmul.mubr.msk.bf16.gmra.mxu0 %vm337_vm1, %v317_v19  ;;  %1330 = vmatprep.subr.bf16.mxu0 %v1597_v1 }
  0x28   : > { %1262 = vmatprep.mubr.msk.bf16.mxu0 %vm1598_vm0, %v1597_v1  ;;  %1275 = vmatmul.mubr.msk.bf16.gmra.mxu1 %vm337_vm1, %v321_v23 }
  0x29   : > { %1287 = vmatpush3.bf16.msra.mxu1 %v1465_v24  ;;  %1294 = vmatprep.mubr.msk.bf16.mxu1 %vm1598_vm0, %v1597_v1 }
  0x2a   : > { %1288 = vmatprep.subr.bf16.mxu1 %v1597_v1  ;;  %1331 = vmatpush3.bf16.msra.mxu0 %v1473_v35 }
  0x2b   : > { %1332 = vmatprep.subr.bf16.mxu0 %v1597_v1 }
  0x2d   : > { %1289 = vmatpush3.bf16.msra.mxu1 %v1466_v28 }
  0x2e   : > { %1290 = vmatprep.subr.bf16.mxu1 %v1597_v1 }
  0x2f   : > { %1263 = vmatmul.mubr.msk.bf16.gmra.mxu0 %vm337_vm1, %v318_v27 }
  0x30   : > { %1338 = vmatprep.mubr.msk.bf16.mxu0 %vm1598_vm0, %v1597_v1 }
  0x31   : > { %1291 = vmatpush3.bf16.msra.mxu1 %v1467_v29 }
  0x32   : > { %1292 = vmatprep.subr.bf16.mxu1 %v1597_v1 }
  0x35   : > { %1293 = vmatpush3.bf16.msra.mxu1 %v1468_v30 }
  0xd7   : > { %v393_v37 = vpop.f32.mrf.mxu0 }
  0xd8   : > { %v394_v38 = vadd.f32 %v1778_v36, %v393_v37  ;;  %v425_v40 = vpop.f32.mrf.mxu1 }
  0xd9   : > { %v1252_v39 = vpop.f32.mrf.mxu0  ;;  %v426_v26 = vadd.f32 %v1778_v36, %v425_v40 }
  0xda   : > { %v462_v42 = vmul.f32 0.01, %v394_v38  ;;  %v1268_v44 = vpop.f32.mrf.mxu1  ;;  %vm448_vm2 = vcmp.ge.f32.partialorder %v394_v38, 0.0 }
  0xdb   : > { %v396_v41 = vpop.f32.mrf.mxu0  ;;  %v470_v32 = vmul.f32 0.01, %v426_v26  ;;  %vm456_vm10 = vcmp.ge.f32.partialorder %v426_v26, 0.0 }
  0xdc   : > { %v397_v43 = vadd.f32 %v1778_v36, %v396_v41  ;;  %v428_v47 = vpop.f32.mrf.mxu1  ;;  %v476_v49 = vsel %vm448_vm2, %v394_v38, %v462_v42 }
  0xdd   : > { %v1253_v45 = vpop.f32.mrf.mxu0  ;;  %v429_v28 = vadd.f32 %v1778_v36, %v428_v47  ;;  %v484_v37 = vsel %vm456_vm10, %v426_v26, %v470_v32 }
  0xde   : > { %vm449_vm3 = vcmp.ge.f32.partialorder %v397_v43, 0.0  ;;  %v463_v46 = vmul.f32 0.01, %v397_v43  ;;  %v1269_v52 = vpop.f32.mrf.mxu1 }
  0xdf   : > { %v401_v48 = vpop.f32.mrf.mxu0  ;;  %v471_v33 = vmul.f32 0.01, %v429_v28  ;;  %vm457_vm11 = vcmp.ge.f32.partialorder %v429_v28, 0.0  ;;  %v1474_v52 = vld [vmem:[%s1994_s5 + $0x10] sm:$0xff]  }
  0xe0   : > { %v477_v50 = vsel %vm449_vm3, %v397_v43, %v463_v46  ;;  %v402_v51 = vadd.f32 %v1778_v36, %v401_v48  ;;  %v433_v55 = vpop.f32.mrf.mxu1  ;;  %1333 = vmatpush3.bf16.msra.mxu0 %v1474_v52 }
  0xe1   : > { %v490_v53 = vpack.c.bf16 %v477_v50, %v476_v49  ;;  %v1256_v54 = vpop.f32.mrf.mxu0  ;;  %v434_v34 = vadd.f32 %v1778_v36, %v433_v55  ;;  %v485_v38 = vsel %vm457_vm11, %v429_v28, %v471_v33  ;;  %1334 = vmatprep.subr.bf16.mxu0 %v1597_v1 }
  0xe2   : > { %v464_v57 = vmul.f32 0.01, %v402_v51  ;;  %v1272_v59 = vpop.f32.mrf.mxu1  ;;  %vm450_vm4 = vcmp.ge.f32.partialorder %v402_v51, 0.0  ;;  %v494_v39 = vpack.c.bf16 %v485_v38, %v484_v37  ;;  %v1820_v54 = vld [vmem:[%s1993_s4] ss:$0 sm:$0xff] }
  0xe3   : > { %v404_v56 = vpop.f32.mrf.mxu0  ;;  %1295 = vmatmul.mubr.bf16.vlgmr.msra.gmra.mxu1 %v490_v53  ;;  %v472_v40 = vmul.f32 0.01, %v434_v34  ;;  %vm458_vm12 = vcmp.ge.f32.partialorder %v434_v34, 0.0  ;;  %v1476_v53 = vld [vmem:[%s1994_s5] sm:$0xff]  }
  0xe4   : > { %v405_v58 = vadd.f32 %v1778_v36, %v404_v56  ;;  %1298 = vmatprep.mubr.msk.bf16.mxu1 %vm1598_vm0, %v1597_v1  ;;  %v436_v62 = vpop.f32.mrf.mxu1  ;;  %v478_v2 = vsel %vm450_vm4, %v402_v51, %v464_v57 }
  0xe5   : > { %v1257_v60 = vpop.f32.mrf.mxu0  ;;  %v437_v35 = vadd.f32 %v1778_v36, %v436_v62  ;;  %v486_v44 = vsel %vm458_vm12, %v434_v34, %v472_v40 }
  0xe6   : > { %vm451_vm5 = vcmp.ge.f32.partialorder %v405_v58, 0.0  ;;  %v465_v61 = vmul.f32 0.01, %v405_v58  ;;  %v1273_v4 = vpop.f32.mrf.mxu1 }
  0xe7   : > { %v409_v63 = vpop.f32.mrf.mxu0  ;;  %v473_v41 = vmul.f32 0.01, %v437_v35  ;;  %vm459_vm13 = vcmp.ge.f32.partialorder %v437_v35, 0.0 }
  0xe8   : > { %v410_v0 = vadd.f32 %v1778_v36, %v409_v63  ;;  %v479_v3 = vsel %vm451_vm5, %v405_v58, %v465_v61  ;;  %v441_v7 = vpop.f32.mrf.mxu1 }
  0xe9   : > { %v1260_v5 = vpop.f32.mrf.mxu0  ;;  %v491_v6 = vpack.c.bf16 %v479_v3, %v478_v2  ;;  %v442_v42 = vadd.f32 %v1778_v36, %v441_v7  ;;  %v487_v45 = vsel %vm459_vm13, %v437_v35, %v473_v41 }
  0xea   : > { %v466_v9 = vmul.f32 0.01, %v410_v0  ;;  %v1276_v11 = vpop.f32.mrf.mxu1  ;;  %vm452_vm6 = vcmp.ge.f32.partialorder %v410_v0, 0.0  ;;  %v495_v46 = vpack.c.bf16 %v487_v45, %v486_v44 }
  0xeb   : > { %v412_v8 = vpop.f32.mrf.mxu0  ;;  %1299 = vmatmul.mubr.bf16.gmra.mxu1 %v491_v6  ;;  %v474_v47 = vmul.f32 0.01, %v442_v42  ;;  %vm460_vm14 = vcmp.ge.f32.partialorder %v442_v42, 0.0 }
  0xec   : > { %v413_v10 = vadd.f32 %v1778_v36, %v412_v8  ;;  %1302 = vmatprep.mubr.msk.bf16.mxu1 %vm1598_vm0, %v1597_v1  ;;  %v444_v14 = vpop.f32.mrf.mxu1  ;;  %v480_v17 = vsel %vm452_vm6, %v410_v0, %v466_v9 }
  0xed   : > { %v1261_v12 = vpop.f32.mrf.mxu0  ;;  %v445_v43 = vadd.f32 %v1778_v36, %v444_v14  ;;  %v488_v49 = vsel %vm460_vm14, %v442_v42, %v474_v47 }
  0xee   : > { %vm453_vm7 = vcmp.ge.f32.partialorder %v413_v10, 0.0  ;;  %v467_v13 = vmul.f32 0.01, %v413_v10  ;;  %v1277_v19 = vpop.f32.mrf.mxu1 }
  0xef   : > { %v417_v15 = vpop.f32.mrf.mxu0  ;;  %v475_v48 = vmul.f32 0.01, %v445_v43  ;;  %vm461_vm15 = vcmp.ge.f32.partialorder %v445_v43, 0.0 }
  0xf0   : > { %v418_v16 = vadd.f32 %v1778_v36, %v417_v15  ;;  %v481_v18 = vsel %vm453_vm7, %v413_v10, %v467_v13 }
  0xf1   : > { %v1264_v20 = vpop.f32.mrf.mxu0  ;;  %v492_v21 = vpack.c.bf16 %v481_v18, %v480_v17  ;;  %v489_v50 = vsel %vm461_vm15, %v445_v43, %v475_v48 }
  0xf2   : > { %v468_v23 = vmul.f32 0.01, %v418_v16  ;;  %vm454_vm8 = vcmp.ge.f32.partialorder %v418_v16, 0.0  ;;  %v496_v51 = vpack.c.bf16 %v489_v50, %v488_v49 }
  0xf3   : > { %v420_v22 = vpop.f32.mrf.mxu0  ;;  %1303 = vmatmul.mubr.bf16.gmra.mxu1 %v492_v21 }
  0xf4   : > { %v421_v24 = vadd.f32 %v1778_v36, %v420_v22  ;;  %1306 = vmatprep.mubr.msk.bf16.mxu1 %vm1598_vm0, %v1597_v1  ;;  %v482_v29 = vsel %vm454_vm8, %v418_v16, %v468_v23  ;;  %v1475_v36 = vld [vmem:[%s1994_s5 + $0x8] sm:$0xff]  }
  0xf5   : > { %v1265_v25 = vpop.f32.mrf.mxu0  ;;  %1335 = vmatpush3.bf16.msra.mxu0 %v1475_v36 }
  0xf6   : > { %vm455_vm9 = vcmp.ge.f32.partialorder %v421_v24, 0.0  ;;  %v469_v27 = vmul.f32 0.01, %v421_v24  ;;  %1336 = vmatprep.subr.bf16.mxu0 %v1597_v1 }
  0xf8   : > { %v483_v30 = vsel %vm455_vm9, %v421_v24, %v469_v27 }
  0xf9   : > { %v493_v31 = vpack.c.bf16 %v483_v30, %v482_v29  ;;  %1337 = vmatpush3.bf16.msra.mxu0 %v1476_v53 }
  0xfb   : > { %1307 = vmatmul.mubr.bf16.gmra.mxu1 %v493_v31 }
  0xfc   : > { %1310 = vmatprep.mubr.msk.bf16.mxu1 %vm1598_vm0, %v1597_v1 }
 0x103   : > { %1311 = vmatmul.mubr.bf16.gmra.mxu1 %v494_v39 }
 0x104   : > { %1314 = vmatprep.mubr.msk.bf16.mxu1 %vm1598_vm0, %v1597_v1 }
 0x10b   : > { %1315 = vmatmul.mubr.bf16.gmra.mxu1 %v495_v46 }
 0x10c   : > { %1318 = vmatprep.mubr.msk.bf16.mxu1 %vm1598_vm0, %v1597_v1 }
 0x113   : > { %1319 = vmatmul.mubr.bf16.gmra.mxu1 %v496_v51 }
 0x1a3   : > { %v602_v55 = vpop.f32.mrf.mxu1 }
 0x1a4   : > { %v603_v56 = vadd.f32 %v1820_v54, %v602_v55 }
 0x1a5   : > { %v1296_v57 = vpop.f32.mrf.mxu1 }
 0x1a6   : > { %v671_v59 = vmul.f32 0.01, %v603_v56  ;;  %vm657_vm1 = vcmp.ge.f32.partialorder %v603_v56, 0.0 }
 0x1a7   : > { %v605_v58 = vpop.f32.mrf.mxu1 }
 0x1a8   : > { %v606_v60 = vadd.f32 %v1820_v54, %v605_v58  ;;  %v685_v0 = vsel %vm657_vm1, %v603_v56, %v671_v59 }
 0x1a9   : > { %v1297_v61 = vpop.f32.mrf.mxu1 }
 0x1aa   : > { %vm658_vm2 = vcmp.ge.f32.partialorder %v606_v60, 0.0  ;;  %v672_v62 = vmul.f32 0.01, %v606_v60 }
 0x1ab   : > { %v610_v63 = vpop.f32.mrf.mxu1 }
 0x1ac   : > { %v686_v2 = vsel %vm658_vm2, %v606_v60, %v672_v62  ;;  %v611_v3 = vadd.f32 %v1820_v54, %v610_v63 }
 0x1ad   : > { %v699_v4 = vpack.c.bf16 %v686_v2, %v685_v0  ;;  %v1300_v5 = vpop.f32.mrf.mxu1 }
 0x1ae   : > { %v673_v7 = vmul.f32 0.01, %v611_v3  ;;  %vm659_vm3 = vcmp.ge.f32.partialorder %v611_v3, 0.0 }
 0x1af   : > { %v613_v6 = vpop.f32.mrf.mxu1  ;;  %1339 = vmatmul.mubr.bf16.vlgmr.msra.gmra.mxu0 %v699_v4 }
 0x1b0   : > { %v614_v8 = vadd.f32 %v1820_v54, %v613_v6  ;;  %1342 = vmatprep.mubr.msk.bf16.mxu0 %vm1598_vm0, %v1597_v1  ;;  %v687_v13 = vsel %vm659_vm3, %v611_v3, %v673_v7  ;;  %v1851_v7 = vld [vmem:[%s1995_s6] ss:$0 sm:$0xff] }
 0x1b1   : > { %v1301_v9 = vpop.f32.mrf.mxu1 }
 0x1b2   : > { %vm660_vm4 = vcmp.ge.f32.partialorder %v614_v8, 0.0  ;;  %v674_v10 = vmul.f32 0.01, %v614_v8 }
 0x1b3   : > { %v618_v11 = vpop.f32.mrf.mxu1 }
 0x1b4   : > { %v619_v12 = vadd.f32 %v1820_v54, %v618_v11  ;;  %v688_v14 = vsel %vm660_vm4, %v614_v8, %v674_v10 }
 0x1b5   : > { %v1304_v15 = vpop.f32.mrf.mxu1  ;;  %v700_v16 = vpack.c.bf16 %v688_v14, %v687_v13 }
 0x1b6   : > { %v675_v18 = vmul.f32 0.01, %v619_v12  ;;  %vm661_vm5 = vcmp.ge.f32.partialorder %v619_v12, 0.0 }
 0x1b7   : > { %v621_v17 = vpop.f32.mrf.mxu1  ;;  %1343 = vmatmul.mubr.bf16.gmra.mxu0 %v700_v16 }
 0x1b8   : > { %v622_v19 = vadd.f32 %v1820_v54, %v621_v17  ;;  %1346 = vmatprep.mubr.msk.bf16.mxu0 %vm1598_vm0, %v1597_v1  ;;  %v689_v24 = vsel %vm661_vm5, %v619_v12, %v675_v18 }
 0x1b9   : > { %v1305_v20 = vpop.f32.mrf.mxu1 }
 0x1ba   : > { %vm662_vm6 = vcmp.ge.f32.partialorder %v622_v19, 0.0  ;;  %v676_v21 = vmul.f32 0.01, %v622_v19 }
 0x1bb   : > { %v626_v22 = vpop.f32.mrf.mxu1 }
 0x1bc   : > { %v627_v23 = vadd.f32 %v1820_v54, %v626_v22  ;;  %v690_v25 = vsel %vm662_vm6, %v622_v19, %v676_v21 }
 0x1bd   : > { %v1308_v26 = vpop.f32.mrf.mxu1  ;;  %v701_v27 = vpack.c.bf16 %v690_v25, %v689_v24 }
 0x1be   : > { %v677_v29 = vmul.f32 0.01, %v627_v23  ;;  %vm663_vm7 = vcmp.ge.f32.partialorder %v627_v23, 0.0 }
 0x1bf   : > { %v629_v28 = vpop.f32.mrf.mxu1  ;;  %1347 = vmatmul.mubr.bf16.gmra.mxu0 %v701_v27 }
 0x1c0   : > { %v630_v30 = vadd.f32 %v1820_v54, %v629_v28  ;;  %1350 = vmatprep.mubr.msk.bf16.mxu0 %vm1598_vm0, %v1597_v1  ;;  %v691_v35 = vsel %vm663_vm7, %v627_v23, %v677_v29 }
 0x1c1   : > { %v1309_v31 = vpop.f32.mrf.mxu1 }
 0x1c2   : > { %vm664_vm8 = vcmp.ge.f32.partialorder %v630_v30, 0.0  ;;  %v678_v32 = vmul.f32 0.01, %v630_v30 }
 0x1c3   : > { %v634_v33 = vpop.f32.mrf.mxu1 }
 0x1c4   : > { %v635_v34 = vadd.f32 %v1820_v54, %v634_v33  ;;  %v692_v37 = vsel %vm664_vm8, %v630_v30, %v678_v32 }
 0x1c5   : > { %v1312_v38 = vpop.f32.mrf.mxu1  ;;  %v702_v39 = vpack.c.bf16 %v692_v37, %v691_v35 }
 0x1c6   : > { %v679_v41 = vmul.f32 0.01, %v635_v34  ;;  %vm665_vm9 = vcmp.ge.f32.partialorder %v635_v34, 0.0 }
 0x1c7   : > { %v637_v40 = vpop.f32.mrf.mxu1  ;;  %1351 = vmatmul.mubr.bf16.gmra.mxu0 %v702_v39 }
 0x1c8   : > { %v638_v42 = vadd.f32 %v1820_v54, %v637_v40  ;;  %1354 = vmatprep.mubr.msk.bf16.mxu0 %vm1598_vm0, %v1597_v1  ;;  %v693_v47 = vsel %vm665_vm9, %v635_v34, %v679_v41 }
 0x1c9   : > { %v1313_v43 = vpop.f32.mrf.mxu1 }
 0x1ca   : > { %vm666_vm10 = vcmp.ge.f32.partialorder %v638_v42, 0.0  ;;  %v680_v44 = vmul.f32 0.01, %v638_v42 }
 0x1cb   : > { %v642_v45 = vpop.f32.mrf.mxu1 }
 0x1cc   : > { %v643_v46 = vadd.f32 %v1820_v54, %v642_v45  ;;  %v694_v48 = vsel %vm666_vm10, %v638_v42, %v680_v44 }
 0x1cd   : > { %v1316_v49 = vpop.f32.mrf.mxu1  ;;  %v703_v50 = vpack.c.bf16 %v694_v48, %v693_v47 }
 0x1ce   : > { %v681_v52 = vmul.f32 0.01, %v643_v46  ;;  %vm667_vm11 = vcmp.ge.f32.partialorder %v643_v46, 0.0 }
 0x1cf   : > { %v645_v51 = vpop.f32.mrf.mxu1  ;;  %1355 = vmatmul.mubr.bf16.gmra.mxu0 %v703_v50 }
 0x1d0   : > { %v646_v36 = vadd.f32 %v1820_v54, %v645_v51  ;;  %1358 = vmatprep.mubr.msk.bf16.mxu0 %vm1598_vm0, %v1597_v1  ;;  %v695_v58 = vsel %vm667_vm11, %v643_v46, %v681_v52 }
 0x1d1   : > { %v1317_v53 = vpop.f32.mrf.mxu1 }
 0x1d2   : > { %vm668_vm12 = vcmp.ge.f32.partialorder %v646_v36, 0.0  ;;  %v682_v55 = vmul.f32 0.01, %v646_v36 }
 0x1d3   : > { %v650_v56 = vpop.f32.mrf.mxu1 }
 0x1d4   : > { %v651_v57 = vadd.f32 %v1820_v54, %v650_v56  ;;  %v696_v59 = vsel %vm668_vm12, %v646_v36, %v682_v55 }
 0x1d5   : > { %v1320_v60 = vpop.f32.mrf.mxu1  ;;  %v704_v61 = vpack.c.bf16 %v696_v59, %v695_v58 }
 0x1d6   : > { %v683_v63 = vmul.f32 0.01, %v651_v57  ;;  %vm669_vm13 = vcmp.ge.f32.partialorder %v651_v57, 0.0 }
 0x1d7   : > { %v653_v62 = vpop.f32.mrf.mxu1  ;;  %1359 = vmatmul.mubr.bf16.gmra.mxu0 %v704_v61 }
 0x1d8   : > { %v654_v0 = vadd.f32 %v1820_v54, %v653_v62  ;;  %1362 = vmatprep.mubr.msk.bf16.mxu0 %vm1598_vm0, %v1597_v1  ;;  %v697_v4 = vsel %vm669_vm13, %v651_v57, %v683_v63  ;;  %vm880_vm0 = vcmask 31744  }
 0x1d9   : > { %v1321_v2 = vpop.f32.mrf.mxu1 }
 0x1da   : > { %vm670_vm14 = vcmp.ge.f32.partialorder %v654_v0, 0.0  ;;  %v684_v3 = vmul.f32 0.01, %v654_v0 }
 0x1dc   : > { %v698_v5 = vsel %vm670_vm14, %v654_v0, %v684_v3 }
 0x1dd   : > { %v705_v6 = vpack.c.bf16 %v698_v5, %v697_v4 }
 0x1df   : > { %1363 = vmatmul.mubr.bf16.gmra.mxu0 %v705_v6 }
 0x26f   : > { %v811_v8 = vpop.f32.mrf.mxu0 }
 0x270   : > { %v812_v54 = vadd.f32 %v1851_v7, %v811_v8 }
 0x271   : > { %v1340_v9 = vpop.f32.mrf.mxu0 }
 0x272   : > { %1477 = vtanh.f32 %v812_v54 }
 0x273   : > { %v814_v1 = vpop.f32.mrf.mxu0 }
 0x274   : > { %v815_v10 = vadd.f32 %v1851_v7, %v814_v1 }
 0x275   : > { %v1341_v11 = vpop.f32.mrf.mxu0 }
 0x276   : > { %1479 = vtanh.f32 %v815_v10 }
 0x277   : > { %v819_v12 = vpop.f32.mrf.mxu0 }
 0x278   : > { %v820_v13 = vadd.f32 %v1851_v7, %v819_v12 }
 0x279   : > { %v1344_v14 = vpop.f32.mrf.mxu0 }
 0x27a   : > { %1481 = vtanh.f32 %v820_v13 }
 0x27b   : > { %v822_v15 = vpop.f32.mrf.mxu0 }
 0x27c   : > { %v823_v16 = vadd.f32 %v1851_v7, %v822_v15 }
 0x27d   : > { %v1345_v17 = vpop.f32.mrf.mxu0 }
 0x27e   : > { %1483 = vtanh.f32 %v823_v16 }
 0x27f   : > { %v1478_v18 = vpop.eup %1477  ;;  %v827_v19 = vpop.f32.mrf.mxu0 }
 0x280   : > { %881 = vst.msk [vmem:[%s1858_s30] sm:$0xff] %vm880_vm0, %v1478_v18  ;;  %v828_v20 = vadd.f32 %v1851_v7, %v827_v19 }
 0x281   : > { %v1348_v21 = vpop.f32.mrf.mxu0 }
 0x282   : > { %1485 = vtanh.f32 %v828_v20 }
 0x283   : > { %v1480_v22 = vpop.eup %1479  ;;  %v830_v23 = vpop.f32.mrf.mxu0 }
 0x284   : > { %882 = vst.msk [vmem:[%s1858_s30 + $0x8] sm:$0xff] %vm880_vm0, %v1480_v22  ;;  %v831_v24 = vadd.f32 %v1851_v7, %v830_v23 }
 0x285   : > { %v1349_v25 = vpop.f32.mrf.mxu0 }
 0x286   : > { %1487 = vtanh.f32 %v831_v24 }
 0x287   : > { %v1482_v26 = vpop.eup %1481  ;;  %v835_v27 = vpop.f32.mrf.mxu0 }
 0x288   : > { %883 = vst.msk [vmem:[%s1858_s30 + $0x10] sm:$0xff] %vm880_vm0, %v1482_v26  ;;  %v836_v28 = vadd.f32 %v1851_v7, %v835_v27 }
 0x289   : > { %v1352_v29 = vpop.f32.mrf.mxu0 }
 0x28a   : > { %1489 = vtanh.f32 %v836_v28 }
 0x28b   : > { %v1484_v30 = vpop.eup %1483  ;;  %v838_v31 = vpop.f32.mrf.mxu0 }
 0x28c   : > { %884 = vst.msk [vmem:[%s1858_s30 + $0x18] sm:$0xff] %vm880_vm0, %v1484_v30  ;;  %v839_v32 = vadd.f32 %v1851_v7, %v838_v31 }
 0x28d   : > { %v1353_v33 = vpop.f32.mrf.mxu0 }
 0x28e   : > { %1491 = vtanh.f32 %v839_v32 }
 0x28f   : > { %v1486_v34 = vpop.eup %1485  ;;  %v843_v35 = vpop.f32.mrf.mxu0 }
 0x290   : > { %885 = vst.msk [vmem:[%s1858_s30 + $0x20] sm:$0xff] %vm880_vm0, %v1486_v34  ;;  %v844_v37 = vadd.f32 %v1851_v7, %v843_v35 }
 0x291   : > { %v1356_v38 = vpop.f32.mrf.mxu0 }
 0x292   : > { %1493 = vtanh.f32 %v844_v37 }
 0x293   : > { %v1488_v39 = vpop.eup %1487  ;;  %v846_v40 = vpop.f32.mrf.mxu0 }
 0x294   : > { %886 = vst.msk [vmem:[%s1858_s30 + $0x28] sm:$0xff] %vm880_vm0, %v1488_v39  ;;  %v847_v41 = vadd.f32 %v1851_v7, %v846_v40 }
 0x295   : > { %v1357_v42 = vpop.f32.mrf.mxu0 }
 0x296   : > { %1495 = vtanh.f32 %v847_v41 }
 0x297   : > { %v1490_v43 = vpop.eup %1489  ;;  %v851_v44 = vpop.f32.mrf.mxu0 }
 0x298   : > { %887 = vst.msk [vmem:[%s1858_s30 + $0x30] sm:$0xff] %vm880_vm0, %v1490_v43  ;;  %v852_v45 = vadd.f32 %v1851_v7, %v851_v44 }
 0x299   : > { %v1360_v46 = vpop.f32.mrf.mxu0 }
 0x29a   : > { %1497 = vtanh.f32 %v852_v45 }
 0x29b   : > { %v1492_v47 = vpop.eup %1491  ;;  %v854_v48 = vpop.f32.mrf.mxu0 }
 0x29c   : > { %888 = vst.msk [vmem:[%s1858_s30 + $0x38] sm:$0xff] %vm880_vm0, %v1492_v47  ;;  %v855_v49 = vadd.f32 %v1851_v7, %v854_v48 }
 0x29d   : > { %v1361_v50 = vpop.f32.mrf.mxu0 }
 0x29e   : > { %1499 = vtanh.f32 %v855_v49 }
 0x29f   : > { %v1494_v51 = vpop.eup %1493  ;;  %v859_v52 = vpop.f32.mrf.mxu0 }
 0x2a0   : > { %889 = vst.msk [vmem:[%s1858_s30 + $0x40] sm:$0xff] %vm880_vm0, %v1494_v51  ;;  %v860_v36 = vadd.f32 %v1851_v7, %v859_v52 }
 0x2a1   : > { %v1364_v53 = vpop.f32.mrf.mxu0 }
 0x2a2   : > { %1501 = vtanh.f32 %v860_v36 }
 0x2a3   : > { %v1496_v55 = vpop.eup %1495  ;;  %v862_v56 = vpop.f32.mrf.mxu0 }
 0x2a4   : > { %890 = vst.msk [vmem:[%s1858_s30 + $0x48] sm:$0xff] %vm880_vm0, %v1496_v55  ;;  %v863_v57 = vadd.f32 %v1851_v7, %v862_v56 }
 0x2a5   : > { %v1365_v58 = vpop.f32.mrf.mxu0 }
 0x2a6   : > { %1503 = vtanh.f32 %v863_v57 }
 0x2a7   : > { %v1498_v59 = vpop.eup %1497 }
 0x2a8   : > { %891 = vst.msk [vmem:[%s1858_s30 + $0x50] sm:$0xff] %vm880_vm0, %v1498_v59 }
 0x2ab   : > { %v1500_v60 = vpop.eup %1499 }
 0x2ac   : > { %892 = vst.msk [vmem:[%s1858_s30 + $0x58] sm:$0xff] %vm880_vm0, %v1500_v60 }
 0x2af   : > { %v1502_v61 = vpop.eup %1501 }
 0x2b0   : > { %893 = vst.msk [vmem:[%s1858_s30 + $0x60] sm:$0xff] %vm880_vm0, %v1502_v61  ;;  %901 = sbr.rel (!%p1664_p4) target bundleno = 746 (0x2ea), region = 52 }
 0x2b3   : > { %v1504_v62 = vpop.eup %1503 }
 0x2b4   : > { %894 = vst.msk [vmem:[%s1858_s30 + $0x68] sm:$0xff] %vm880_vm0, %v1504_v62 }
 0x2b5   : > { %s2005_s24 = smov (!%p904_p8, %s903_s24), 14 }
 0x2b6   : > { %s1197_s15 = sshll.u32 %s2005_s24, 7 }
 0x2b7   : > { %p1200_p9 = scmp.eq.s32.totalorder %s1197_s15, 0 }
 0x2b8   : > { %1505 = sdivrem.u32 (!%p1200_p9), %s2005_s24, 14 }
 0x2b9   : > { %912 = sbr.rel (%p1200_p9) target bundleno = 746 (0x2ea), region = 56 }
 0x2c1   : > { %s1911_s9 = spop.drf %1505 }
 0x2c2   : > { %p1201_p10 = scmp.le.s32.totalorder %s1911_s9, 0 }
 0x2c3   : > { %s1998_s27 = smov (!%p1201_p10), %s1905_s14  ;;  %s1999_s12 = smov (!%p1201_p10), %s1858_s30 }
 0x2c4   : > { %1121 = sbr.rel (%p1201_p10) target bundleno = 721 (0x2d1), region = 132  ;;  %s1920_s16 = smov (!%p1201_p10), 0  }
 0x2c5   : > { %s1922_s17 = smov (!%p1201_p10), 0  }
 0x2c9 LB: >> { %v1003_v63 = vld [vmem:[%s1571_s12] sm:$0xff]  ;;  %v1005_v0 = vld [vmem:[%s1571_s12 + $0x8] sm:$0xff]  ;;  %v1007_v2 = vld [vmem:[%s1571_s12 + $0x10] sm:$0xff]  ;;  %s1031_s18 = sadd.s32 1, %s1575_s16  ;;  %s997_s17 = sadd.s32 1, %s1579_s17   ;;  %s1579_s17 = sphi %s1922_s17, %s997_s17   ;;  %s1575_s16 = sphi %s1920_s16, %s2000_s16   ;;  %s1571_s12 = sphi %s1999_s12, %s1036_s12   ;;  %s1567_s27 = sphi %s1998_s27, %s1037_s27  }
 0x2ca   : >> { %1004 = vst [vmem:[%s1567_s27] sm:$0xff] %v1003_v63  ;;  %1006 = vst [vmem:[%s1567_s27 + $0x8] sm:$0xff] %v1005_v0  ;;  %v1009_v3 = vld [vmem:[%s1571_s12 + $0x18] sm:$0xff]  ;;  %v1011_v4 = vld [vmem:[%s1571_s12 + $0x20] sm:$0xff]  ;;  %p1032_p11 = scmp.ge.s32.totalorder %s1031_s18, %s1911_s9  ;;  %p996_p12 = scmp.ge.s32.totalorder %s997_s17, %s1911_s9 }
 0x2cb   : >> { %1008 = vst [vmem:[%s1567_s27 + $0x10] sm:$0xff] %v1007_v2  ;;  %v1013_v5 = vld [vmem:[%s1571_s12 + $0x28] sm:$0xff]  ;;  %1010 = vst [vmem:[%s1567_s27 + $0x18] sm:$0xff] %v1009_v3  ;;  %v1015_v6 = vld [vmem:[%s1571_s12 + $0x30] sm:$0xff] }
 0x2cc   : >> { %1012 = vst [vmem:[%s1567_s27 + $0x20] sm:$0xff] %v1011_v4  ;;  %1014 = vst [vmem:[%s1567_s27 + $0x28] sm:$0xff] %v1013_v5  ;;  %v1017_v7 = vld [vmem:[%s1571_s12 + $0x38] sm:$0xff]  ;;  %v1019_v8 = vld [vmem:[%s1571_s12 + $0x40] sm:$0xff]  ;;  %s2007_s18 = smov (%p1032_p11, %s1031_s18), 0  ;;  %999 = sbr.rel (!%p996_p12) target bundleno = 713 (0x2c9), region = 138 }
 0x2cd   : >> { %1016 = vst [vmem:[%s1567_s27 + $0x30] sm:$0xff] %v1015_v6  ;;  %1018 = vst [vmem:[%s1567_s27 + $0x38] sm:$0xff] %v1017_v7  ;;  %v1021_v54 = vld [vmem:[%s1571_s12 + $0x48] sm:$0xff]  ;;  %v1023_v9 = vld [vmem:[%s1571_s12 + $0x50] sm:$0xff]  ;;  %s1034_s19 = smul.u32 112, %s2007_s18  ;;  %s2000_s16 = smov %s2007_s18 }
 0x2ce   : >> { %1020 = vst [vmem:[%s1567_s27 + $0x40] sm:$0xff] %v1019_v8  ;;  %v1025_v1 = vld [vmem:[%s1571_s12 + $0x58] sm:$0xff]  ;;  %1022 = vst [vmem:[%s1567_s27 + $0x48] sm:$0xff] %v1021_v54  ;;  %v1027_v10 = vld [vmem:[%s1571_s12 + $0x60] sm:$0xff] }
 0x2cf   : >> { %1024 = vst [vmem:[%s1567_s27 + $0x50] sm:$0xff] %v1023_v9  ;;  %1026 = vst [vmem:[%s1567_s27 + $0x58] sm:$0xff] %v1025_v1  ;;  %v1029_v11 = vld [vmem:[%s1571_s12 + $0x68] sm:$0xff]  ;;  %s1036_s12 = scalar_lea.vmem %s1858_s30, %s1034_s19 [#allocation2]  }
 0x2d0   : >> { %1028 = vst [vmem:[%s1567_s27 + $0x60] sm:$0xff] %v1027_v10  ;;  %1030 = vst [vmem:[%s1567_s27 + $0x68] sm:$0xff] %v1029_v11  ;;  %s1037_s27 = scalar_lea.vmem %s1905_s14, %s1034_s19  }
 0x2d1 PF: > { %1507 = sdivrem.u32 %s2005_s24, 14 }
 0x2d2   : > { %s1202_s20 = smul.u32 112, %s1911_s9 }
 0x2d4   : > { %s1042_s21 = scalar_lea.vmem %s1858_s30, %s1202_s20 [#allocation2]   ;;  %s1044_s22 = scalar_lea.vmem %s1905_s14, %s1202_s20  }
 0x2da   : > { %s1508_s23 = spop.drf %1507 }
 0x2db   : > { %p1204_p13 = scmp.le.s32.totalorder %s1508_s23, 0 }
 0x2dc   : > { %s1581_s26 = smov (!%p1204_p13), %s1044_s22   ;;  %s1585_s29 = smov (!%p1204_p13), %s1042_s21  }
 0x2dd   : > { %1135 = sbr.rel (%p1204_p13) target bundleno = 746 (0x2ea), region = 143  ;;  %s1589_s10 = smov (!%p1204_p13), 0  }
 0x2de   : > { %s1593_s11 = smov (!%p1204_p13), 0  }
 0x2e2 LB: >> { %v1054_v12 = vld [vmem:[%s1587_s29] sm:$0xff]  ;;  %s1056_s13 = sadd.s32 1, %s1591_s10  ;;  %s1048_s11 = sadd.s32 1, %s1595_s11   ;;  %s1595_s11 = sphi %s1593_s11, %s1048_s11   ;;  %s1591_s10 = sphi %s1589_s10, %s1590_s10   ;;  %s1587_s29 = sphi %s1585_s29, %s1061_s29   ;;  %s1583_s26 = sphi %s1581_s26, %s1062_s26  }
 0x2e3   : >> { %1055 = vst [vmem:[%s1583_s26] sm:$0xff] %v1054_v12  ;;  %p1057_p0 = scmp.ge.s32.totalorder %s1056_s13, %s1508_s23  ;;  %p1047_p1 = scmp.ge.s32.totalorder %s1048_s11, %s1508_s23 }
 0x2e5   : >> { %s2009_s13 = smov (%p1057_p0, %s1056_s13), 0  ;;  %1050 = sbr.rel (!%p1047_p1) target bundleno = 738 (0x2e2), region = 149 }
 0x2e6   : >> { %s1205_s30 = sshll.u32 %s2009_s13, 3  ;;  %s1590_s10 = smov %s2009_s13  }
 0x2e7   : >> { %s1061_s29 = scalar_lea.vmem %s1042_s21, %s1205_s30 [#allocation2]   ;;  %s1062_s26 = scalar_lea.vmem %s1044_s22, %s1205_s30  }
 0x2ea PF: > { %p14_p2 = scmp.ge.s32.totalorder %s1654_s28, 4   ;;  %s2001_s24 = smov %s1559_s25 }
 0x2eb   : > { %s2002_s25 = smov %s1662_s8  ;;  %s2003_s26 = smov %s1654_s28 }
 0x2ec   :  { %16 = sbr.rel (!%p14_p2) target bundleno = 2 (0x2), region = 160 }

</bundles_post_ra>
